<compile_context>
chip_gen: v7x
topology: tpu7x:2x2x1
jax: 0.10.0
libtpu: 0.0.40
codegen_flags: <defaults>
</compile_context>

<pallas_src>
import functools

import jax
import jax.numpy as jnp
from jax.experimental import pallas as pl
from jax.experimental.pallas import tpu as pltpu

_BN_EPS = 1e-5
_COMPUTE_DTYPE = jnp.bfloat16   # MXU operands; all BN / elementwise math stays f32


def _fused_gcn2_kernel(
    # inputs
    a_ref, x_ref,
    w1_ref, b1_ref, g1_ref, be1_ref,
    w2_ref, b2_ref, g2_ref, be2_ref,
    # output
    o_ref,
    # scratch
    proj_ref, h1_ref, s1_ref, ss1_ref, s2_ref, ss2_ref,
    *, tile_n, n_real, n_pad, h1, h2, proj_width, a_resident, compute_dtype,
):
    """Fused 2-layer GCN.  grid = (layer pass, row tile); tiles iterate fastest."""
    p = pl.program_id(0)                       # 0: layer 1, 1: layer 2
    i = pl.program_id(1)                       # row-tile index
    n_tiles = pl.num_programs(1)
    row0 = pl.multiple_of(i * tile_n, tile_n)
    inv_n = 1.0 / float(n_real)
    padded = n_pad != n_real

    def load_a_tile():
        if a_resident:
            t = a_ref[pl.ds(row0, tile_n), :]          # resident A, sliced rows
        else:
            t = a_ref[...]                             # streamed (tile_n, n_pad) block
        return t.astype(compute_dtype)                 # no-op when already bf16

    def store_proj(val, width):
        if width == proj_width:
            proj_ref[...] = val
        else:
            proj_ref[:, :width] = val

    def project(feats_cdt, wcat_ref, bcat_ref, width):
        # One lane-dense (n_pad, 2H) projection: [feats @ W | feats @ W_res + b_res].
        pr = jnp.dot(feats_cdt, wcat_ref[...].astype(compute_dtype),
                     preferred_element_type=jnp.float32) + bcat_ref[...]
        store_proj(pr.astype(compute_dtype), width)

    def bn_scale_shift(s_ref, ss_ref, g_ref, be_ref):
        mean = s_ref[...] * inv_n
        var = jnp.maximum(ss_ref[...] * inv_n - mean * mean, 0.0)   # biased variance
        scale = g_ref[...] * jax.lax.rsqrt(var + _BN_EPS)
        shift = be_ref[...] - mean * scale
        return scale, shift

    def stat_update(y, s_ref, ss_ref):
        if padded:
            rows = row0 + jax.lax.broadcasted_iota(jnp.int32, (tile_n, 1), 0)
            y = jnp.where(rows < n_real, y, 0.0)        # mask zero-padded rows
        s_ref[...] += jnp.sum(y, axis=0, keepdims=True)
        ss_ref[...] += jnp.sum(y * y, axis=0, keepdims=True)

    def tile_out(h_out):
        a_t = load_a_tile()                                             # (tile_n, n_pad)
        agg = jnp.dot(a_t, proj_ref[:, 0:h_out],                        # A_tile @ (X @ W)
                      preferred_element_type=jnp.float32)
        res = proj_ref[pl.ds(row0, tile_n), pl.ds(h_out, h_out)]        # precomputed residual
        return jnp.maximum(agg, 0.0) + jnp.maximum(res.astype(jnp.float32), 0.0)

    # ----------------------------- pass 0: layer 1 -----------------------------
    @pl.when(p == 0)
    def _layer1():
        @pl.when(i == 0)
        def _init1():
            s1_ref[...] = jnp.zeros_like(s1_ref)
            ss1_ref[...] = jnp.zeros_like(ss1_ref)
            project(x_ref[...].astype(compute_dtype), w1_ref, b1_ref, 2 * h1)

        y = tile_out(h1)
        h1_ref[pl.ds(row0, tile_n), :] = y.astype(compute_dtype)   # raw (pre-BN) layer-1 act
        stat_update(y, s1_ref, ss1_ref)

    # ----------------------------- pass 1: layer 2 -----------------------------
    @pl.when(p == 1)
    def _layer2():
        @pl.when(i == 0)
        def _init2():
            s2_ref[...] = jnp.zeros_like(s2_ref)
            ss2_ref[...] = jnp.zeros_like(ss2_ref)
            # BatchNorm-1 folded into the layer-2 projection input; h1 never rewritten.
            scale1, shift1 = bn_scale_shift(s1_ref, ss1_ref, g1_ref, be1_ref)
            y1n = h1_ref[...].astype(jnp.float32) * scale1 + shift1
            project(y1n.astype(compute_dtype), w2_ref, b2_ref, 2 * h2)

        y = tile_out(h2)
        o_ref[pl.ds(row0, tile_n), :] = y
        stat_update(y, s2_ref, ss2_ref)

        @pl.when(i == n_tiles - 1)
        def _finalize():
            scale2, shift2 = bn_scale_shift(s2_ref, ss2_ref, g2_ref, be2_ref)
            o_ref[...] = o_ref[...] * scale2 + shift2


def _full_spec(shape):
    # Full-array resident block (constant index_map -> no re-DMA across grid steps).
    return pl.BlockSpec(shape, lambda p, i: (0,) * len(shape))


def _vmem_capacity_bytes():
    try:
        return int(pltpu.get_tpu_info().vmem_capacity_bytes)
    except Exception:
        return 64 << 20          # conservative (v7x) default


def _round_up(x, m):
    return -(-x // m) * m


def _gcn2_forward(a, x, layer1, layer2):
    """Fused forward of the default 2-layer GCN (shapes are static under jit)."""
    n, f_in = x.shape
    h1 = layer1["w"].shape[1]
    h2 = layer2["w"].shape[1]
    hmax = max(h1, h2)
    f32 = jnp.float32

    cap = _vmem_capacity_bytes()
    budget = int(cap * 0.80)             # headroom for compiler-internal scratch
    vmem_limit = int(cap * 0.85)

    def fixed_bytes(n_pad):
        # Pipelined (BlockSpec) buffers counted x2, explicit scratch x1.
        return (2 * n_pad * f_in * 4                         # X resident
                + 2 * n_pad * h2 * 4                         # output resident
                + n_pad * 2 * hmax * 2                       # proj scratch (bf16)
                + n_pad * h1 * 2                             # h1 scratch (bf16)
                + 8 * (f_in * 2 * h1 + h1 * 2 * h2 + 4 * (h1 + h2))
                + (1 << 20))                                 # accumulators / slack

    # ---- adjacency residency + row-tile size (per-generation VMEM budget) ----
    n_pad = _round_up(max(n, 8), 32)
    a_resident = fixed_bytes(n_pad) + 2 * n_pad * n_pad * 2 <= budget
    if a_resident:
        tile_n = 32
        for cand in (512, 256, 128, 64):
            if n_pad % cand == 0:
                tile_n = cand
                break
        a_in = a.astype(jnp.bfloat16)     # 0/1 exact; one HBM read, resident both passes
        a_spec = pl.BlockSpec((n_pad, n_pad), lambda p, i: (0, 0))
    else:
        tile_n = 32
        for cand in (1024, 512, 256, 128, 64, 32):
            np_c = _round_up(n, cand)
            if fixed_bytes(np_c) + 2 * cand * np_c <= budget:
                tile_n, n_pad = cand, np_c
                break
        a_in = a.astype(jnp.int8)         # 0/1 exact; halves the dominant HBM stream
        a_spec = pl.BlockSpec((tile_n, n_pad), lambda p, i: (i, 0))
    n_tiles = n_pad // tile_n

    if n_pad != n:                        # robust tiling for non-divisible N
        a_in = jnp.pad(a_in, ((0, n_pad - n), (0, n_pad - n)))
        x_in = jnp.pad(x, ((0, n_pad - n), (0, 0)))
    else:
        x_in = x

    # Concatenated lane-dense weights [W | W_res]; bias only on the residual half.
    w1c = jnp.concatenate([layer1["w"], layer1["w_res"]], axis=1).astype(f32)
    b1c = jnp.concatenate([jnp.zeros((1, h1), f32),
                           layer1["b_res"].reshape(1, h1).astype(f32)], axis=1)
    w2c = jnp.concatenate([layer2["w"], layer2["w_res"]], axis=1).astype(f32)
    b2c = jnp.concatenate([jnp.zeros((1, h2), f32),
                           layer2["b_res"].reshape(1, h2).astype(f32)], axis=1)
    g1 = layer1["gamma"].reshape(1, h1).astype(f32)
    be1 = layer1["beta"].reshape(1, h1).astype(f32)
    g2 = layer2["gamma"].reshape(1, h2).astype(f32)
    be2 = layer2["beta"].reshape(1, h2).astype(f32)

    kernel = functools.partial(
        _fused_gcn2_kernel,
        tile_n=tile_n, n_real=n, n_pad=n_pad, h1=h1, h2=h2,
        proj_width=2 * hmax, a_resident=a_resident, compute_dtype=_COMPUTE_DTYPE)

    grid_spec = pltpu.PrefetchScalarGridSpec(
        num_scalar_prefetch=0,
        grid=(2, n_tiles),                      # (layer pass, row tile)
        in_specs=[
            a_spec,
            _full_spec(x_in.shape),
            _full_spec(w1c.shape), _full_spec(b1c.shape),
            _full_spec(g1.shape), _full_spec(be1.shape),
            _full_spec(w2c.shape), _full_spec(b2c.shape),
            _full_spec(g2.shape), _full_spec(be2.shape),
        ],
        out_specs=pl.BlockSpec((n_pad, h2), lambda p, i: (0, 0)),   # resident output
        scratch_shapes=[
            pltpu.VMEM((n_pad, 2 * hmax), _COMPUTE_DTYPE),   # hoisted [X@W | X@Wr+b] proj
            pltpu.VMEM((n_pad, h1), _COMPUTE_DTYPE),         # raw layer-1 activations
            pltpu.VMEM((1, h1), jnp.float32),                # layer-1 sum(y)
            pltpu.VMEM((1, h1), jnp.float32),                # layer-1 sum(y^2)
            pltpu.VMEM((1, h2), jnp.float32),                # layer-2 sum(y)
            pltpu.VMEM((1, h2), jnp.float32),                # layer-2 sum(y^2)
        ],
    )

    out = pl.pallas_call(
        kernel,
        out_shape=jax.ShapeDtypeStruct((n_pad, h2), jnp.float32),
        grid_spec=grid_spec,
        # Both axes carry VMEM state (layer-2 depends on all of layer-1, BN sums
        # span row tiles) -> sequential.  TODO(synk): v7x 2-TC core_map split.
        compiler_params=pltpu.CompilerParams(
            dimension_semantics=("arbitrary", "arbitrary"),
            vmem_limit_bytes=vmem_limit),
    )(a_in, x_in, w1c, b1c, g1, be1, w2c, b2c, g2, be2)

    return out[:n] if n_pad != n else out


@jax.jit
def gcn_forward(a, x, params):
    """GCN.forward for the default 2-layer configuration (fully fused)."""
    assert len(params) == 2, "fused kernel covers the default hidden_features=[64, 64]"
    return _gcn2_forward(a, x, params[0], params[1])


def init_gcn_params(key, in_features, hidden_features=(64, 64)):
    """Deterministic synthetic parameter init (shapes match the PyTorch module)."""
    params = []
    fin = in_features
    for h in hidden_features:
        key, k1, k2, k3 = jax.random.split(key, 4)
        scale_w = 1.0 / jnp.sqrt(jnp.float32(fin))
        params.append({
            "w": jax.random.uniform(k1, (fin, h), jnp.float32, -scale_w, scale_w),
            "w_res": jax.random.uniform(k2, (fin, h), jnp.float32, -scale_w, scale_w),
            "b_res": jax.random.uniform(k3, (1, h), jnp.float32, -scale_w, scale_w),
            "gamma": jnp.ones((1, h), jnp.float32),
            "beta": jnp.zeros((1, h), jnp.float32),
        })
        fin = h
    return params


def _reference(a, x, params):
    """Pure-JAX f32 reference of the module forward (training-mode BN)."""
    a = a.astype(jnp.float32)
    h = x
    for lp in params:
        agg = jnp.maximum(a @ h @ lp["w"], 0.0)
        res = jnp.maximum(h @ lp["w_res"] + lp["b_res"], 0.0)
        y = agg + res
        mean = y.mean(axis=0, keepdims=True)
        var = ((y - mean) ** 2).mean(axis=0, keepdims=True)
        h = (y - mean) * jax.lax.rsqrt(var + _BN_EPS) * lp["gamma"] + lp["beta"]
    return h


if __name__ == "__main__":
    N = 32            # number of graph nodes
    IN_FEATURES = 16  # input node-feature dim
    HIDDEN = (64, 64)

    key = jax.random.PRNGKey(0)
    key, k_adj, k_x, k_params = jax.random.split(key, 4)

    # Dense random 0/1 adjacency, no self loops, stored int8 (bandwidth format).
    adj = jax.random.uniform(k_adj, (N, N)) < 0.2
    adj = jnp.logical_and(adj, ~jnp.eye(N, dtype=bool)).astype(jnp.int8)

    x = jax.random.normal(k_x, (N, IN_FEATURES), jnp.float32)
    params = init_gcn_params(k_params, IN_FEATURES, HIDDEN)

    out = gcn_forward(adj, x, params)
    jax.block_until_ready(out)
    assert out.shape == (N, HIDDEN[-1]) and out.dtype == jnp.float32

    ref = _reference(adj, x, params)
    max_err = float(jnp.max(jnp.abs(out - ref)))
    assert max_err < 0.25, f"kernel vs reference max abs error too large: {max_err}"

    print("KERNEL_OK")
</pallas_src>

<mosaic_0001>
module attributes {stable_mosaic.version = 11 : i64} {
  func.func @_fused_gcn2_kernel(%arg0: i32, %arg1: i32, %arg2: memref<32x32xbf16, #tpu.memory_space<vmem>>, %arg3: memref<32x16xf32, #tpu.memory_space<vmem>>, %arg4: memref<16x128xf32, #tpu.memory_space<vmem>>, %arg5: memref<1x128xf32, #tpu.memory_space<vmem>>, %arg6: memref<1x64xf32, #tpu.memory_space<vmem>>, %arg7: memref<1x64xf32, #tpu.memory_space<vmem>>, %arg8: memref<64x128xf32, #tpu.memory_space<vmem>>, %arg9: memref<1x128xf32, #tpu.memory_space<vmem>>, %arg10: memref<1x64xf32, #tpu.memory_space<vmem>>, %arg11: memref<1x64xf32, #tpu.memory_space<vmem>>, %arg12: memref<32x64xf32, #tpu.memory_space<vmem>>, %arg13: memref<32x128xbf16, #tpu.memory_space<vmem>>, %arg14: memref<32x64xbf16, #tpu.memory_space<vmem>>, %arg15: memref<1x64xf32, #tpu.memory_space<vmem>>, %arg16: memref<1x64xf32, #tpu.memory_space<vmem>>, %arg17: memref<1x64xf32, #tpu.memory_space<vmem>>, %arg18: memref<1x64xf32, #tpu.memory_space<vmem>>) attributes {dimension_semantics = [#tpu.dimension_semantics<arbitrary>, #tpu.dimension_semantics<arbitrary>], iteration_bounds = array<i64: 2, 1>, scalar_prefetch = 0 : i64, scratch_operands = 6 : i64, tpu.core_type = #tpu.core_type<tc>, window_params = [{pipeline_mode = #tpu.pipeline_mode<synchronous>, transform_indices = @transform_0, window_bounds = array<i64: 32, 32>}, {pipeline_mode = #tpu.pipeline_mode<synchronous>, transform_indices = @transform_1, window_bounds = array<i64: 32, 16>}, {pipeline_mode = #tpu.pipeline_mode<synchronous>, transform_indices = @transform_2, window_bounds = array<i64: 16, 128>}, {pipeline_mode = #tpu.pipeline_mode<synchronous>, transform_indices = @transform_3, window_bounds = array<i64: 1, 128>}, {pipeline_mode = #tpu.pipeline_mode<synchronous>, transform_indices = @transform_4, window_bounds = array<i64: 1, 64>}, {pipeline_mode = #tpu.pipeline_mode<synchronous>, transform_indices = @transform_5, window_bounds = array<i64: 1, 64>}, {pipeline_mode = #tpu.pipeline_mode<synchronous>, transform_indices = @transform_6, window_bounds = array<i64: 64, 128>}, {pipeline_mode = #tpu.pipeline_mode<synchronous>, transform_indices = @transform_7, window_bounds = array<i64: 1, 128>}, {pipeline_mode = #tpu.pipeline_mode<synchronous>, transform_indices = @transform_8, window_bounds = array<i64: 1, 64>}, {pipeline_mode = #tpu.pipeline_mode<synchronous>, transform_indices = @transform_9, window_bounds = array<i64: 1, 64>}, {pipeline_mode = #tpu.pipeline_mode<synchronous>, transform_indices = @transform_10, window_bounds = array<i64: 32, 64>}]} {
    %c32_i32 = arith.constant 32 : i32
    %0 = arith.muli %arg1, %c32_i32 : i32
    %1 = tpu.assume_multiple %0, 32 : i32
    %c0_i32 = arith.constant 0 : i32
    %2 = arith.cmpi eq, %arg0, %c0_i32 : i32
    %3 = arith.extui %2 : i1 to i32
    %c0_i32_0 = arith.constant 0 : i32
    %4 = arith.cmpi ne, %3, %c0_i32_0 : i32
    scf.if %4 {
      %c0_i32_2 = arith.constant 0 : i32
      %8 = arith.cmpi eq, %arg1, %c0_i32_2 : i32
      %9 = arith.extui %8 : i1 to i32
      %c0_i32_3 = arith.constant 0 : i32
      %10 = arith.cmpi ne, %9, %c0_i32_3 : i32
      scf.if %10 {
        %cst_19 = arith.constant 0.000000e+00 : f32
        %37 = vector.broadcast %cst_19 : f32 to vector<1x64xf32>
        %c0_20 = arith.constant 0 : index
        %c0_21 = arith.constant 0 : index
        %38 = vector.load %arg15[%c0_20, %c0_21] : memref<1x64xf32, #tpu.memory_space<vmem>>, vector<1x64xf32>
        tpu.vector_store %arg15[%c0_20, %c0_21], %37 {strides = array<i32>} : memref<1x64xf32, #tpu.memory_space<vmem>>, vector<1x64xf32>,
        %cst_22 = arith.constant 0.000000e+00 : f32
        %39 = vector.broadcast %cst_22 : f32 to vector<1x64xf32>
        %c0_23 = arith.constant 0 : index
        %c0_24 = arith.constant 0 : index
        %40 = vector.load %arg16[%c0_23, %c0_24] : memref<1x64xf32, #tpu.memory_space<vmem>>, vector<1x64xf32>
        tpu.vector_store %arg16[%c0_23, %c0_24], %39 {strides = array<i32>} : memref<1x64xf32, #tpu.memory_space<vmem>>, vector<1x64xf32>,
        %c0_25 = arith.constant 0 : index
        %c0_26 = arith.constant 0 : index
        %41 = vector.load %arg3[%c0_25, %c0_26] : memref<32x16xf32, #tpu.memory_space<vmem>>, vector<32x16xf32>
        %42 = arith.truncf %41 : vector<32x16xf32> to vector<32x16xbf16>
        %c0_27 = arith.constant 0 : index
        %c0_28 = arith.constant 0 : index
        %43 = vector.load %arg4[%c0_27, %c0_28] : memref<16x128xf32, #tpu.memory_space<vmem>>, vector<16x128xf32>
        %44 = arith.truncf %43 : vector<16x128xf32> to vector<16x128xbf16>
        %cst_29 = arith.constant dense<0.000000e+00> : vector<32x128xf32>
        %45 = tpu.matmul %42, %44, %cst_29 {dimension_numbers = #tpu.dot_dimension_numbers<[1], [0], [0], [1], [0, 0, 1, 1], [], []>} : vector<32x16xbf16>, vector<16x128xbf16>, vector<32x128xf32> -> vector<32x128xf32>
        %c0_30 = arith.constant 0 : index
        %c0_31 = arith.constant 0 : index
        %46 = vector.load %arg5[%c0_30, %c0_31] : memref<1x128xf32, #tpu.memory_space<vmem>>, vector<1x128xf32>
        %47 = vector.broadcast %46 : vector<1x128xf32> to vector<32x128xf32>
        %48 = arith.addf %45, %47 : vector<32x128xf32>
        %49 = arith.truncf %48 : vector<32x128xf32> to vector<32x128xbf16>
        %c0_32 = arith.constant 0 : index
        %c0_33 = arith.constant 0 : index
        %50 = vector.load %arg13[%c0_32, %c0_33] : memref<32x128xbf16, #tpu.memory_space<vmem>>, vector<32x128xbf16>
        tpu.vector_store %arg13[%c0_32, %c0_33], %49 {strides = array<i32>} : memref<32x128xbf16, #tpu.memory_space<vmem>>, vector<32x128xbf16>,
      } else {
      }
      %11 = arith.index_cast %1 : i32 to index
      %c0 = arith.constant 0 : index
      %12 = vector.load %arg2[%11, %c0] : memref<32x32xbf16, #tpu.memory_space<vmem>>, vector<32x32xbf16>
      %c0_4 = arith.constant 0 : index
      %c0_5 = arith.constant 0 : index
      %13 = vector.load %arg13[%c0_4, %c0_5] : memref<32x128xbf16, #tpu.memory_space<vmem>>, vector<32x64xbf16>
      %cst = arith.constant dense<0.000000e+00> : vector<32x64xf32>
      %14 = tpu.matmul %12, %13, %cst {dimension_numbers = #tpu.dot_dimension_numbers<[1], [0], [0], [1], [0, 0, 1, 1], [], []>} : vector<32x32xbf16>, vector<32x64xbf16>, vector<32x64xf32> -> vector<32x64xf32>
      %15 = arith.index_cast %1 : i32 to index
      %c64 = arith.constant 64 : index
      %16 = vector.load %arg13[%15, %c64] : memref<32x128xbf16, #tpu.memory_space<vmem>>, vector<32x64xbf16>
      %cst_6 = arith.constant 0.000000e+00 : f32
      %17 = vector.broadcast %cst_6 : f32 to vector<32x64xf32>
      %18 = arith.maximumf %14, %17 : vector<32x64xf32>
      %19 = arith.extf %16 : vector<32x64xbf16> to vector<32x64xf32>
      %cst_7 = arith.constant 0.000000e+00 : f32
      %20 = vector.broadcast %cst_7 : f32 to vector<32x64xf32>
      %21 = arith.maximumf %19, %20 : vector<32x64xf32>
      %22 = arith.addf %18, %21 : vector<32x64xf32>
      %23 = arith.truncf %22 : vector<32x64xf32> to vector<32x64xbf16>
      %24 = arith.index_cast %1 : i32 to index
      %c0_8 = arith.constant 0 : index
      %25 = vector.load %arg14[%24, %c0_8] : memref<32x64xbf16, #tpu.memory_space<vmem>>, vector<32x64xbf16>
      tpu.vector_store %arg14[%24, %c0_8], %23 {strides = array<i32>} : memref<32x64xbf16, #tpu.memory_space<vmem>>, vector<32x64xbf16>,
      %c0_9 = arith.constant 0 : index
      %c0_10 = arith.constant 0 : index
      %26 = vector.load %arg15[%c0_9, %c0_10] : memref<1x64xf32, #tpu.memory_space<vmem>>, vector<1x64xf32>
      %cst_11 = arith.constant dense<0.000000e+00> : vector<64xf32>
      %27 = vector.multi_reduction <add>, %22, %cst_11 [0] : vector<32x64xf32> to vector<64xf32>
      %28 = vector.shape_cast %27 : vector<64xf32> to vector<1x64xf32>
      %29 = arith.addf %26, %28 : vector<1x64xf32>
      %c0_12 = arith.constant 0 : index
      %c0_13 = arith.constant 0 : index
      %30 = vector.load %arg15[%c0_12, %c0_13] : memref<1x64xf32, #tpu.memory_space<vmem>>, vector<1x64xf32>
      tpu.vector_store %arg15[%c0_12, %c0_13], %29 {strides = array<i32>} : memref<1x64xf32, #tpu.memory_space<vmem>>, vector<1x64xf32>,
      %c0_14 = arith.constant 0 : index
      %c0_15 = arith.constant 0 : index
      %31 = vector.load %arg16[%c0_14, %c0_15] : memref<1x64xf32, #tpu.memory_space<vmem>>, vector<1x64xf32>
      %32 = arith.mulf %22, %22 : vector<32x64xf32>
      %cst_16 = arith.constant dense<0.000000e+00> : vector<64xf32>
      %33 = vector.multi_reduction <add>, %32, %cst_16 [0] : vector<32x64xf32> to vector<64xf32>
      %34 = vector.shape_cast %33 : vector<64xf32> to vector<1x64xf32>
      %35 = arith.addf %31, %34 : vector<1x64xf32>
      %c0_17 = arith.constant 0 : index
      %c0_18 = arith.constant 0 : index
      %36 = vector.load %arg16[%c0_17, %c0_18] : memref<1x64xf32, #tpu.memory_space<vmem>>, vector<1x64xf32>
      tpu.vector_store %arg16[%c0_17, %c0_18], %35 {strides = array<i32>} : memref<1x64xf32, #tpu.memory_space<vmem>>, vector<1x64xf32>,
    } else {
    }
    %c1_i32 = arith.constant 1 : i32
    %5 = arith.cmpi eq, %arg0, %c1_i32 : i32
    %6 = arith.extui %5 : i1 to i32
    %c0_i32_1 = arith.constant 0 : i32
    %7 = arith.cmpi ne, %6, %c0_i32_1 : i32
    scf.if %7 {
      %c0_i32_2 = arith.constant 0 : i32
      %8 = arith.cmpi eq, %arg1, %c0_i32_2 : i32
      %9 = arith.extui %8 : i1 to i32
      %c0_i32_3 = arith.constant 0 : i32
      %10 = arith.cmpi ne, %9, %c0_i32_3 : i32
      scf.if %10 {
        %cst_21 = arith.constant 0.000000e+00 : f32
        %39 = vector.broadcast %cst_21 : f32 to vector<1x64xf32>
        %c0_22 = arith.constant 0 : index
        %c0_23 = arith.constant 0 : index
        %40 = vector.load %arg17[%c0_22, %c0_23] : memref<1x64xf32, #tpu.memory_space<vmem>>, vector<1x64xf32>
        tpu.vector_store %arg17[%c0_22, %c0_23], %39 {strides = array<i32>} : memref<1x64xf32, #tpu.memory_space<vmem>>, vector<1x64xf32>,
        %cst_24 = arith.constant 0.000000e+00 : f32
        %41 = vector.broadcast %cst_24 : f32 to vector<1x64xf32>
        %c0_25 = arith.constant 0 : index
        %c0_26 = arith.constant 0 : index
        %42 = vector.load %arg18[%c0_25, %c0_26] : memref<1x64xf32, #tpu.memory_space<vmem>>, vector<1x64xf32>
        tpu.vector_store %arg18[%c0_25, %c0_26], %41 {strides = array<i32>} : memref<1x64xf32, #tpu.memory_space<vmem>>, vector<1x64xf32>,
        %c0_27 = arith.constant 0 : index
        %c0_28 = arith.constant 0 : index
        %43 = vector.load %arg15[%c0_27, %c0_28] : memref<1x64xf32, #tpu.memory_space<vmem>>, vector<1x64xf32>
        %cst_29 = arith.constant 3.125000e-02 : f32
        %44 = vector.broadcast %cst_29 : f32 to vector<1x64xf32>
        %45 = arith.mulf %43, %44 : vector<1x64xf32>
        %c0_30 = arith.constant 0 : index
        %c0_31 = arith.constant 0 : index
        %46 = vector.load %arg16[%c0_30, %c0_31] : memref<1x64xf32, #tpu.memory_space<vmem>>, vector<1x64xf32>
        %cst_32 = arith.constant 3.125000e-02 : f32
        %47 = vector.broadcast %cst_32 : f32 to vector<1x64xf32>
        %48 = arith.mulf %46, %47 : vector<1x64xf32>
        %49 = arith.mulf %45, %45 : vector<1x64xf32>
        %50 = arith.subf %48, %49 : vector<1x64xf32>
        %cst_33 = arith.constant 0.000000e+00 : f32
        %51 = vector.broadcast %cst_33 : f32 to vector<1x64xf32>
        %52 = arith.maximumf %50, %51 : vector<1x64xf32>
        %c0_34 = arith.constant 0 : index
        %c0_35 = arith.constant 0 : index
        %53 = vector.load %arg6[%c0_34, %c0_35] : memref<1x64xf32, #tpu.memory_space<vmem>>, vector<1x64xf32>
        %cst_36 = arith.constant 9.99999974E-6 : f32
        %54 = vector.broadcast %cst_36 : f32 to vector<1x64xf32>
        %55 = arith.addf %52, %54 : vector<1x64xf32>
        %56 = math.rsqrt %55 : vector<1x64xf32>
        %57 = arith.mulf %53, %56 : vector<1x64xf32>
        %c0_37 = arith.constant 0 : index
        %c0_38 = arith.constant 0 : index
        %58 = vector.load %arg7[%c0_37, %c0_38] : memref<1x64xf32, #tpu.memory_space<vmem>>, vector<1x64xf32>
        %59 = arith.mulf %45, %57 : vector<1x64xf32>
        %60 = arith.subf %58, %59 : vector<1x64xf32>
        %c0_39 = arith.constant 0 : index
        %c0_40 = arith.constant 0 : index
        %61 = vector.load %arg14[%c0_39, %c0_40] : memref<32x64xbf16, #tpu.memory_space<vmem>>, vector<32x64xbf16>
        %62 = arith.extf %61 : vector<32x64xbf16> to vector<32x64xf32>
        %63 = vector.broadcast %57 : vector<1x64xf32> to vector<32x64xf32>
        %64 = arith.mulf %62, %63 : vector<32x64xf32>
        %65 = vector.broadcast %60 : vector<1x64xf32> to vector<32x64xf32>
        %66 = arith.addf %64, %65 : vector<32x64xf32>
        %67 = arith.truncf %66 : vector<32x64xf32> to vector<32x64xbf16>
        %c0_41 = arith.constant 0 : index
        %c0_42 = arith.constant 0 : index
        %68 = vector.load %arg8[%c0_41, %c0_42] : memref<64x128xf32, #tpu.memory_space<vmem>>, vector<64x128xf32>
        %69 = arith.truncf %68 : vector<64x128xf32> to vector<64x128xbf16>
        %cst_43 = arith.constant dense<0.000000e+00> : vector<32x128xf32>
        %70 = tpu.matmul %67, %69, %cst_43 {dimension_numbers = #tpu.dot_dimension_numbers<[1], [0], [0], [1], [0, 0, 1, 1], [], []>} : vector<32x64xbf16>, vector<64x128xbf16>, vector<32x128xf32> -> vector<32x128xf32>
        %c0_44 = arith.constant 0 : index
        %c0_45 = arith.constant 0 : index
        %71 = vector.load %arg9[%c0_44, %c0_45] : memref<1x128xf32, #tpu.memory_space<vmem>>, vector<1x128xf32>
        %72 = vector.broadcast %71 : vector<1x128xf32> to vector<32x128xf32>
        %73 = arith.addf %70, %72 : vector<32x128xf32>
        %74 = arith.truncf %73 : vector<32x128xf32> to vector<32x128xbf16>
        %c0_46 = arith.constant 0 : index
        %c0_47 = arith.constant 0 : index
        %75 = vector.load %arg13[%c0_46, %c0_47] : memref<32x128xbf16, #tpu.memory_space<vmem>>, vector<32x128xbf16>
        tpu.vector_store %arg13[%c0_46, %c0_47], %74 {strides = array<i32>} : memref<32x128xbf16, #tpu.memory_space<vmem>>, vector<32x128xbf16>,
      } else {
      }
      %11 = arith.index_cast %1 : i32 to index
      %c0 = arith.constant 0 : index
      %12 = vector.load %arg2[%11, %c0] : memref<32x32xbf16, #tpu.memory_space<vmem>>, vector<32x32xbf16>
      %c0_4 = arith.constant 0 : index
      %c0_5 = arith.constant 0 : index
      %13 = vector.load %arg13[%c0_4, %c0_5] : memref<32x128xbf16, #tpu.memory_space<vmem>>, vector<32x64xbf16>
      %cst = arith.constant dense<0.000000e+00> : vector<32x64xf32>
      %14 = tpu.matmul %12, %13, %cst {dimension_numbers = #tpu.dot_dimension_numbers<[1], [0], [0], [1], [0, 0, 1, 1], [], []>} : vector<32x32xbf16>, vector<32x64xbf16>, vector<32x64xf32> -> vector<32x64xf32>
      %15 = arith.index_cast %1 : i32 to index
      %c64 = arith.constant 64 : index
      %16 = vector.load %arg13[%15, %c64] : memref<32x128xbf16, #tpu.memory_space<vmem>>, vector<32x64xbf16>
      %cst_6 = arith.constant 0.000000e+00 : f32
      %17 = vector.broadcast %cst_6 : f32 to vector<32x64xf32>
      %18 = arith.maximumf %14, %17 : vector<32x64xf32>
      %19 = arith.extf %16 : vector<32x64xbf16> to vector<32x64xf32>
      %cst_7 = arith.constant 0.000000e+00 : f32
      %20 = vector.broadcast %cst_7 : f32 to vector<32x64xf32>
      %21 = arith.maximumf %19, %20 : vector<32x64xf32>
      %22 = arith.addf %18, %21 : vector<32x64xf32>
      %23 = arith.index_cast %1 : i32 to index
      %c0_8 = arith.constant 0 : index
      %24 = vector.load %arg12[%23, %c0_8] : memref<32x64xf32, #tpu.memory_space<vmem>>, vector<32x64xf32>
      tpu.vector_store %arg12[%23, %c0_8], %22 {strides = array<i32>} : memref<32x64xf32, #tpu.memory_space<vmem>>, vector<32x64xf32>,
      %c0_9 = arith.constant 0 : index
      %c0_10 = arith.constant 0 : index
      %25 = vector.load %arg17[%c0_9, %c0_10] : memref<1x64xf32, #tpu.memory_space<vmem>>, vector<1x64xf32>
      %cst_11 = arith.constant dense<0.000000e+00> : vector<64xf32>
      %26 = vector.multi_reduction <add>, %22, %cst_11 [0] : vector<32x64xf32> to vector<64xf32>
      %27 = vector.shape_cast %26 : vector<64xf32> to vector<1x64xf32>
      %28 = arith.addf %25, %27 : vector<1x64xf32>
      %c0_12 = arith.constant 0 : index
      %c0_13 = arith.constant 0 : index
      %29 = vector.load %arg17[%c0_12, %c0_13] : memref<1x64xf32, #tpu.memory_space<vmem>>, vector<1x64xf32>
      tpu.vector_store %arg17[%c0_12, %c0_13], %28 {strides = array<i32>} : memref<1x64xf32, #tpu.memory_space<vmem>>, vector<1x64xf32>,
      %c0_14 = arith.constant 0 : index
      %c0_15 = arith.constant 0 : index
      %30 = vector.load %arg18[%c0_14, %c0_15] : memref<1x64xf32, #tpu.memory_space<vmem>>, vector<1x64xf32>
      %31 = arith.mulf %22, %22 : vector<32x64xf32>
      %cst_16 = arith.constant dense<0.000000e+00> : vector<64xf32>
      %32 = vector.multi_reduction <add>, %31, %cst_16 [0] : vector<32x64xf32> to vector<64xf32>
      %33 = vector.shape_cast %32 : vector<64xf32> to vector<1x64xf32>
      %34 = arith.addf %30, %33 : vector<1x64xf32>
      %c0_17 = arith.constant 0 : index
      %c0_18 = arith.constant 0 : index
      %35 = vector.load %arg18[%c0_17, %c0_18] : memref<1x64xf32, #tpu.memory_space<vmem>>, vector<1x64xf32>
      tpu.vector_store %arg18[%c0_17, %c0_18], %34 {strides = array<i32>} : memref<1x64xf32, #tpu.memory_space<vmem>>, vector<1x64xf32>,
      %c0_i32_19 = arith.constant 0 : i32
      %36 = arith.cmpi eq, %arg1, %c0_i32_19 : i32
      %37 = arith.extui %36 : i1 to i32
      %c0_i32_20 = arith.constant 0 : i32
      %38 = arith.cmpi ne, %37, %c0_i32_20 : i32
      scf.if %38 {
        %c0_21 = arith.constant 0 : index
        %c0_22 = arith.constant 0 : index
        %39 = vector.load %arg17[%c0_21, %c0_22] : memref<1x64xf32, #tpu.memory_space<vmem>>, vector<1x64xf32>
        %cst_23 = arith.constant 3.125000e-02 : f32
        %40 = vector.broadcast %cst_23 : f32 to vector<1x64xf32>
        %41 = arith.mulf %39, %40 : vector<1x64xf32>
        %c0_24 = arith.constant 0 : index
        %c0_25 = arith.constant 0 : index
        %42 = vector.load %arg18[%c0_24, %c0_25] : memref<1x64xf32, #tpu.memory_space<vmem>>, vector<1x64xf32>
        %cst_26 = arith.constant 3.125000e-02 : f32
        %43 = vector.broadcast %cst_26 : f32 to vector<1x64xf32>
        %44 = arith.mulf %42, %43 : vector<1x64xf32>
        %45 = arith.mulf %41, %41 : vector<1x64xf32>
        %46 = arith.subf %44, %45 : vector<1x64xf32>
        %cst_27 = arith.constant 0.000000e+00 : f32
        %47 = vector.broadcast %cst_27 : f32 to vector<1x64xf32>
        %48 = arith.maximumf %46, %47 : vector<1x64xf32>
        %c0_28 = arith.constant 0 : index
        %c0_29 = arith.constant 0 : index
        %49 = vector.load %arg10[%c0_28, %c0_29] : memref<1x64xf32, #tpu.memory_space<vmem>>, vector<1x64xf32>
        %cst_30 = arith.constant 9.99999974E-6 : f32
        %50 = vector.broadcast %cst_30 : f32 to vector<1x64xf32>
        %51 = arith.addf %48, %50 : vector<1x64xf32>
        %52 = math.rsqrt %51 : vector<1x64xf32>
        %53 = arith.mulf %49, %52 : vector<1x64xf32>
        %c0_31 = arith.constant 0 : index
        %c0_32 = arith.constant 0 : index
        %54 = vector.load %arg11[%c0_31, %c0_32] : memref<1x64xf32, #tpu.memory_space<vmem>>, vector<1x64xf32>
        %55 = arith.mulf %41, %53 : vector<1x64xf32>
        %56 = arith.subf %54, %55 : vector<1x64xf32>
        %c0_33 = arith.constant 0 : index
        %c0_34 = arith.constant 0 : index
        %57 = vector.load %arg12[%c0_33, %c0_34] : memref<32x64xf32, #tpu.memory_space<vmem>>, vector<32x64xf32>
        %58 = vector.broadcast %53 : vector<1x64xf32> to vector<32x64xf32>
        %59 = arith.mulf %57, %58 : vector<32x64xf32>
        %60 = vector.broadcast %56 : vector<1x64xf32> to vector<32x64xf32>
        %61 = arith.addf %59, %60 : vector<32x64xf32>
        %c0_35 = arith.constant 0 : index
        %c0_36 = arith.constant 0 : index
        %62 = vector.load %arg12[%c0_35, %c0_36] : memref<32x64xf32, #tpu.memory_space<vmem>>, vector<32x64xf32>
        tpu.vector_store %arg12[%c0_35, %c0_36], %61 {strides = array<i32>} : memref<32x64xf32, #tpu.memory_space<vmem>>, vector<32x64xf32>,
      } else {
      }
    } else {
    }
    return
  }
  func.func @transform_0(%arg0: i32, %arg1: i32) -> (i32, i32) {
    %c0_i32 = arith.constant 0 : i32
    %c0_i32_0 = arith.constant 0 : i32
    %c0_i32_1 = arith.constant 0 : i32
    return %c0_i32, %c0_i32_0 : i32, i32
  }
  func.func @transform_1(%arg0: i32, %arg1: i32) -> (i32, i32) {
    %c0_i32 = arith.constant 0 : i32
    %c0_i32_0 = arith.constant 0 : i32
    %c0_i32_1 = arith.constant 0 : i32
    return %c0_i32, %c0_i32_0 : i32, i32
  }
  func.func @transform_2(%arg0: i32, %arg1: i32) -> (i32, i32) {
    %c0_i32 = arith.constant 0 : i32
    %c0_i32_0 = arith.constant 0 : i32
    %c0_i32_1 = arith.constant 0 : i32
    return %c0_i32, %c0_i32_0 : i32, i32
  }
  func.func @transform_3(%arg0: i32, %arg1: i32) -> (i32, i32) {
    %c0_i32 = arith.constant 0 : i32
    %c0_i32_0 = arith.constant 0 : i32
    %c0_i32_1 = arith.constant 0 : i32
    return %c0_i32, %c0_i32_0 : i32, i32
  }
  func.func @transform_4(%arg0: i32, %arg1: i32) -> (i32, i32) {
    %c0_i32 = arith.constant 0 : i32
    %c0_i32_0 = arith.constant 0 : i32
    %c0_i32_1 = arith.constant 0 : i32
    return %c0_i32, %c0_i32_0 : i32, i32
  }
  func.func @transform_5(%arg0: i32, %arg1: i32) -> (i32, i32) {
    %c0_i32 = arith.constant 0 : i32
    %c0_i32_0 = arith.constant 0 : i32
    %c0_i32_1 = arith.constant 0 : i32
    return %c0_i32, %c0_i32_0 : i32, i32
  }
  func.func @transform_6(%arg0: i32, %arg1: i32) -> (i32, i32) {
    %c0_i32 = arith.constant 0 : i32
    %c0_i32_0 = arith.constant 0 : i32
    %c0_i32_1 = arith.constant 0 : i32
    return %c0_i32, %c0_i32_0 : i32, i32
  }
  func.func @transform_7(%arg0: i32, %arg1: i32) -> (i32, i32) {
    %c0_i32 = arith.constant 0 : i32
    %c0_i32_0 = arith.constant 0 : i32
    %c0_i32_1 = arith.constant 0 : i32
    return %c0_i32, %c0_i32_0 : i32, i32
  }
  func.func @transform_8(%arg0: i32, %arg1: i32) -> (i32, i32) {
    %c0_i32 = arith.constant 0 : i32
    %c0_i32_0 = arith.constant 0 : i32
    %c0_i32_1 = arith.constant 0 : i32
    return %c0_i32, %c0_i32_0 : i32, i32
  }
  func.func @transform_9(%arg0: i32, %arg1: i32) -> (i32, i32) {
    %c0_i32 = arith.constant 0 : i32
    %c0_i32_0 = arith.constant 0 : i32
    %c0_i32_1 = arith.constant 0 : i32
    return %c0_i32, %c0_i32_0 : i32, i32
  }
  func.func @transform_10(%arg0: i32, %arg1: i32) -> (i32, i32) {
    %c0_i32 = arith.constant 0 : i32
    %c0_i32_0 = arith.constant 0 : i32
    %c0_i32_1 = arith.constant 0 : i32
    return %c0_i32, %c0_i32_0 : i32, i32
  }
}

</mosaic_0001>

<bundles_post_ra>
// kernel: gcn_forward.1
= control target key start
LH: loop header
LB: loop body
LE: loop exit
PB: predicated region body
PF: predicated region fallthrough
CT: control target
= control target key end

     0   :  { %15 = vsyncpa [#allocation9], 0  ;;  %s1225_s13 = smov 0   ;;  %s1227_s14 = smov 0   ;;  %s1403_s0 = inlined_call_operand.vmem [shape: bf16[32,32], index: 0, kind: input, shape index: {}]   ;;  %s1404_s1 = inlined_call_operand.vmem [shape: f32[32,16], index: 1, kind: input, shape index: {}]   ;;  %s1405_s2 = inlined_call_operand.vmem [shape: f32[16,128], index: 2, kind: input, shape index: {}]   ;;  %s1406_s3 = inlined_call_operand.vmem [shape: f32[1,128], index: 3, kind: input, shape index: {}]   ;;  %s1407_s4 = inlined_call_operand.vmem [shape: f32[1,64], index: 4, kind: input, shape index: {}]   ;;  %s1408_s5 = inlined_call_operand.vmem [shape: f32[1,64], index: 5, kind: input, shape index: {}]   ;;  %s1409_s6 = inlined_call_operand.vmem [shape: f32[64,128], index: 6, kind: input, shape index: {}]   ;;  %s1410_s7 = inlined_call_operand.vmem [shape: f32[1,128], index: 7, kind: input, shape index: {}]   ;;  %s1411_s8 = inlined_call_operand.vmem [shape: f32[1,64], index: 8, kind: input, shape index: {}]   ;;  %s1412_s9 = inlined_call_operand.vmem [shape: f32[1,64], index: 9, kind: input, shape index: {}]   ;;  %s1413_s10 = inlined_call_operand.hbm [shape: f32[32,64], index: 10, kind: output, shape index: {}]  }
   0x1   :  { %s1229_s15 = smov 0  }
   0x2 LB: > { %s976_s16 = sadd.s32 4294967295, %s1161_s15   ;;  %s33_s17 = sadd.s32 1, %s1157_s14  ;;  %s1161_s15 = sphi %s1229_s15, %s21_s15   ;;  %s1157_s14 = sphi %s1227_s14, %s1416_s14   ;;  %s1153_s13 = sphi %s1225_s13, %s1415_s13  }
   0x3   : > { %p35_p0 = scmp.ge.s32.totalorder %s33_s17, 2  ;;  %p978_p1 = scmp.ge.s32.totalorder %s1161_s15, 1 }
   0x4   : > { %p310_p2 = scmp.lt.s32.totalorder %s1161_s15, 3 }
   0x5   : > { %s1418_s17 = smov (%p35_p0, %s33_s17), 0 }
   0x6   : > { %p311_p3 = pnand %p978_p1, %p310_p2 }
   0x7   : > { %p979_p4 = scmp.ne.s32.totalorder (!%p311_p3), %s1153_s13, 0 }
   0x8   : > { %314 = sbr.rel (%p311_p3) target bundleno = 1065 (0x429), region = 60 }
   0xf   : > { %343 = sbr.rel (%p979_p4) target bundleno = 492 (0x1ec), region = 64  ;;  %v357_v0 = vld [vmem:[%s1405_s2] sm:$0xff] (!%p979_p4)  ;;  %v358_v1 = vld [vmem:[%s1405_s2 + $0x8] sm:$0xff] (!%p979_p4)  ;;  %vm367_vm0 = vcmask (!%p979_p4), 130048   ;;  %v353_v5 = vld [vmem:[%s1404_s1 + $0x10] sm:$0xff] (!%p979_p4)  ;;  %vm447_vm1 = vcmask (!%p979_p4), 261120  }
  0x10   : > { %v351_v2 = vld [vmem:[%s1404_s1] sm:$0xff] (!%p979_p4)  ;;  %v359_v3 = vpack.c.bf16 (!%p979_p4), %v358_v1, %v357_v0  ;;  %v352_v4 = vld [vmem:[%s1404_s1 + $0x8] sm:$0xff] (!%p979_p4)  ;;  %v354_v6 = vld [vmem:[%s1404_s1 + $0x18] sm:$0xff] (!%p979_p4)  ;;  %s1163_s19 = smov (!%p979_p4), 64   ;;  %vm348_vm2 = vcmask (!%p979_p4), 516096   ;;  %v1164_v29 = vmov (!%p979_p4), 0.0  }
  0x11   : > { %v355_v7 = vpack.c.bf16 (!%p979_p4), %v352_v4, %v351_v2  ;;  %v356_v8 = vpack.c.bf16 (!%p979_p4), %v354_v6, %v353_v5  ;;  %v1092_v9 = vld [vmem:[%s1403_s0] sm:$0xff] (!%p979_p4)   ;;  %v1093_v27 = vld [vmem:[%s1403_s0 + $0x8] sm:$0xff] (!%p979_p4)   ;;  %349 = vst.msk [vmem:[#allocation4] sm:$0x1] (!%p979_p4), %vm348_vm2, %v1164_v29  ;;  %350 = vst.msk [vmem:[#allocation5] sm:$0x1] (!%p979_p4), %vm348_vm2, %v1164_v29 }
  0x12   : > { %1016 = vmatprep.subr.bf16.mxu0 (!%p979_p4), %v359_v3  ;;  %1026 = vmatprep.mubr.msk.bf16.mxu1 (!%p979_p4), %vm447_vm1, %v1092_v9  ;;  %v980_v11 = vld [vmem:[%s1406_s3] ss:$0 sm:$0xff] (!%p979_p4)  ;;  %vm545_vm3 = vcmask (!%p979_p4), 523264  }
  0x13   : > { %1017 = vmatpush3.bf16.msra.mxu0 (!%p979_p4), %v359_v3  ;;  %1018 = vmatprep.mubr.msk.bf16.mxu0 (!%p979_p4), %vm367_vm0, %v355_v7 }
  0x16   : > { %1019 = vmatmul.mubr.msk.bf16.vlgmr.msra.gmra.mrb[0].mxu0 %vm367_vm0, %v356_v8 }
  0xe9   : > { %v1020_v10 = vpop.f32.mrb[0].mxu0 }
  0xea   : > { %v408_v12 = vpop.f32.mrb[1].mxu0  ;;  %v417_v14 = vadd.f32 %v1020_v10, %v980_v11  ;;  %v548_v10 = vld [vmem:[#allocation4] sm:$0x1] }
  0xeb   : > { %v1021_v13 = vpop.f32.mrb[2].mxu0  ;;  %v409_v17 = vadd.f32 %v980_v11, %v408_v12 }
  0xec   : > { %v420_v15 = vadd.f32 %v1021_v13, %v980_v11  ;;  %v411_v16 = vpop.f32.mrb[3].mxu0  ;;  %v565_v13 = vld [vmem:[#allocation5] sm:$0x1] }
  0xed   : > { %v412_v18 = vadd.f32 %v980_v11, %v411_v16  ;;  %v517_v23 = vmax.f32 %v409_v17, 0.0 }
  0xee   : > { %v424_v19 = vpack.c.bf16 %v420_v15, %v417_v14 }
  0xef   : > { %v423_v20 = vpack.c.bf16 %v412_v18, %v409_v17  ;;  %v518_v24 = vmax.f32 %v412_v18, 0.0 }
  0xf0   : > { %v516_v21 = vunpack.c.h.bf16 %v424_v19  ;;  %v515_v25 = vunpack.c.l.bf16 %v424_v19 }
  0xf1   : > { %1022 = vmatprep.subr.bf16.mxu1 %v423_v20  ;;  %v1087_v26 = vpack.i.bf16 %v518_v24, %v517_v23 }
  0xf2   : > { %1023 = vmatpush3.bf16.msra.mxu1 %v423_v20  ;;  %v520_v22 = vmax.f32 %v516_v21, 0.0  ;;  %v519_v28 = vmax.f32 %v515_v25, 0.0 }
  0xf3   : > { %1024 = vmatprep.subr.bf16.mxu1 %v424_v19  ;;  %1088 = vrot.lane.b32.xlu0 %v1087_v26, %s1163_s19 }
  0xf4   : > { %531 = vrot.lane.b32.xlu1 %v520_v22, %s1163_s19 }
  0xf6   : > { %1025 = vmatpush3.bf16.msra.mxu1 %v424_v19 }
  0xf7   : > { %529 = vrot.lane.b32.xlu0 %v519_v28, %s1163_s19 }
  0xf9   : > { %1027 = vmatmul.mubr.msk.bf16.vlgmr.msra.gmra.mrb[0].mxu1 %vm447_vm1, %v1093_v27 }
 0x165   : > { %v1089_v30 = vpop.permute.xlu0 %1088 }
 0x166   : > { %v532_v40 = vpop.permute.xlu1 %531 }
 0x169   : > { %v530_v34 = vpop.permute.xlu0 %529 }
 0x1cc   : > { %v1028_v31 = vpop.f32.mrb[0].mxu1 }
 0x1cd   : > { %v511_v32 = vmax.f32 %v1028_v31, 0.0  ;;  %v488_v33 = vpop.f32.mrb[1].mxu1 }
 0x1ce   : > { %v509_v35 = vmax.f32 %v488_v33, 0.0  ;;  %v1029_v36 = vpop.f32.mrb[2].mxu1 }
 0x1cf   : > { %v539_v37 = vadd.f32 %v530_v34, %v511_v32  ;;  %v512_v38 = vmax.f32 %v1029_v36, 0.0  ;;  %v491_v39 = vpop.f32.mrb[3].mxu1 }
 0x1d0   : > { %v1105_v41 = vadd.low.f32.bf16 %v509_v35, %v1089_v30  ;;  %v510_v42 = vmax.f32 %v491_v39, 0.0 }
 0x1d1   : > { %v540_v43 = vadd.f32 %v532_v40, %v512_v38  ;;  %v568_v46 = vmul.f32 %v539_v37, %v539_v37  ;;  %v552_v53 = vsel %vm545_vm3, %v539_v37, 0.0 }
 0x1d2   : > { %v566_v44 = vmul.f32 %v1105_v41, %v1105_v41  ;;  %v1106_v45 = vadd.high.f32.bf16 %v510_v42, %v1089_v30  ;;  %v549_v48 = vsel %vm545_vm3, %v1105_v41, 0.0 }
 0x1d3   : > { %v542_v47 = vpack.c.bf16 %v540_v43, %v539_v37  ;;  %v569_v55 = vmul.f32 %v540_v43, %v540_v43  ;;  %v573_v59 = vsel %vm545_vm3, %v568_v46, 0.0  ;;  %v554_v60 = vsel %vm545_vm3, %v540_v43, 0.0 }
 0x1d4   : > { %v541_v49 = vpack.c.bf16 %v1106_v45, %v1105_v41  ;;  %v550_v50 = vsel %vm545_vm3, %v1106_v45, 0.0  ;;  %v567_v51 = vmul.f32 %v1106_v45, %v1106_v45  ;;  %v570_v54 = vsel %vm545_vm3, %v566_v44, 0.0 }
 0x1d5   : > { %547 = vst.msk [vmem:[#allocation3 + $0x8] sm:$0xff] %vm545_vm3, %v542_v47  ;;  %v551_v52 = vadd.f32 %v550_v50, %v549_v48  ;;  %v575_v63 = vsel %vm545_vm3, %v569_v55, 0.0 }
 0x1d6   : > { %546 = vst.msk [vmem:[#allocation3] sm:$0xff] %vm545_vm3, %v541_v49  ;;  %v571_v56 = vsel %vm545_vm3, %v567_v51, 0.0 }
 0x1d7   : > { %v553_v57 = vadd.f32 %v552_v53, %v551_v52  ;;  %v572_v58 = vadd.f32 %v571_v56, %v570_v54 }
 0x1d9   : > { %v555_v61 = vadd.f32 %v554_v60, %v553_v57  ;;  %v574_v62 = vadd.f32 %v573_v59, %v572_v58 }
 0x1db   : > { %v556_v0 = vrot.slane %v555_v61, 4  ;;  %v576_v1 = vadd.f32 %v575_v63, %v574_v62 }
 0x1dd   : > { %v557_v2 = vadd.f32 %v556_v0, %v555_v61  ;;  %v577_v3 = vrot.slane %v576_v1, 4 }
 0x1df   : > { %v558_v4 = vrot.slane %v557_v2, 2  ;;  %v578_v5 = vadd.f32 %v577_v3, %v576_v1 }
 0x1e1   : > { %v559_v6 = vadd.f32 %v558_v4, %v557_v2  ;;  %v579_v7 = vrot.slane %v578_v5, 2 }
 0x1e3   : > { %v560_v8 = vrot.slane %v559_v6, 1  ;;  %v580_v9 = vadd.f32 %v579_v7, %v578_v5 }
 0x1e5   : > { %v561_v11 = vadd.f32 %v560_v8, %v559_v6  ;;  %v581_v12 = vrot.slane %v580_v9, 1 }
 0x1e7   : > { %v562_v14 = vadd.f32 %v561_v11, %v548_v10  ;;  %v582_v15 = vadd.f32 %v581_v12, %v580_v9 }
 0x1e9   : > { %564 = vst.msk [vmem:[#allocation4] sm:$0x1] %vm348_vm2, %v562_v14  ;;  %v583_v16 = vadd.f32 %v582_v15, %v565_v13 }
 0x1eb   : > { %584 = vst.msk [vmem:[#allocation5] sm:$0x1] %vm348_vm2, %v583_v16 }
 0x1ec PF: > { %p987_p5 = scmp.ne.s32.totalorder %s1153_s13, 1 }
 0x1ed   : > { %v638_v17 = vld [vmem:[%s1409_s6] sm:$0xff] (!%p987_p5)  ;;  %v639_v18 = vld [vmem:[%s1409_s6 + $0x8] sm:$0xff] (!%p987_p5)  ;;  %v640_v19 = vld [vmem:[%s1409_s6 + $0x10] sm:$0xff] (!%p987_p5)  ;;  %v617_v37 = vlaneseq (!%p987_p5)  ;;  %vm657_vm4 = vcmask (!%p987_p5), 523264   ;;  %vm737_vm5 = vcmask (!%p987_p5), 261120   ;;  %s1165_s13 = smov (!%p987_p5), 64  }
 0x1ee   : > { %588 = sbr.rel (%p987_p5) target bundleno = 1039 (0x40f), region = 72  ;;  %v646_v20 = vpack.c.bf16 (!%p987_p5), %v639_v18, %v638_v17  ;;  %v641_v21 = vld [vmem:[%s1409_s6 + $0x18] sm:$0xff] (!%p987_p5)  ;;  %v642_v23 = vld [vmem:[%s1409_s6 + $0x20] sm:$0xff] (!%p987_p5)  ;;  %v643_v24 = vld [vmem:[%s1409_s6 + $0x28] sm:$0xff] (!%p987_p5)  ;;  %vm593_vm6 = vcmask (!%p987_p5), 516096  }
 0x1ef   : > { %v647_v22 = vpack.c.bf16 (!%p987_p5), %v641_v21, %v640_v19  ;;  %v648_v29 = vpack.c.bf16 (!%p987_p5), %v643_v24, %v642_v23  ;;  %v644_v31 = vld [vmem:[%s1409_s6 + $0x30] sm:$0xff] (!%p987_p5)  ;;  %v645_v32 = vld [vmem:[%s1409_s6 + $0x38] sm:$0xff] (!%p987_p5)  ;;  %v618_v38 = vshrl.u32 (!%p987_p5), %v617_v37, 7  ;;  %v603_v39 = vld [vmem:[%s1407_s4] sm:$0x1] (!%p987_p5) }
 0x1f0   : > { %v596_v25 = vld [vmem:[#allocation4] sm:$0x1] (!%p987_p5)  ;;  %1030 = vmatprep.subr.bf16.mxu0 (!%p987_p5), %v646_v20  ;;  %v649_v34 = vpack.c.bf16 (!%p987_p5), %v645_v32, %v644_v31  ;;  %v610_v40 = vld [vmem:[#allocation3] sm:$0xff] (!%p987_p5)  ;;  %v611_v41 = vld [vmem:[#allocation3 + $0x8] sm:$0xff] (!%p987_p5) }
 0x1f1   : > { %v597_v26 = vmul.f32 (!%p987_p5), 0.03125, %v596_v25  ;;  %1031 = vmatpush3.bf16.msra.mxu0 (!%p987_p5), %v646_v20  ;;  %v1318_v42 = vsub.s32 (!%p987_p5), 0, %v618_v38  ;;  %v612_v45 = vunpack.c.l.bf16 (!%p987_p5), %v610_v40  ;;  %v613_v46 = vunpack.c.h.bf16 (!%p987_p5), %v610_v40  ;;  %v607_v48 = vld [vmem:[%s1408_s5] sm:$0x1] (!%p987_p5)  ;;  %v1100_v18 = vld [vmem:[%s1403_s0 + $0x8] sm:$0xff] (!%p987_p5)  }
 0x1f2   : > { %v598_v27 = vld [vmem:[#allocation5] sm:$0x1] (!%p987_p5)  ;;  %1032 = vmatprep.subr.bf16.mxu0 (!%p987_p5), %v647_v22  ;;  %v614_v47 = vunpack.c.l.bf16 (!%p987_p5), %v611_v41  ;;  %v615_v49 = vunpack.c.h.bf16 (!%p987_p5), %v611_v41  ;;  %v1099_v0 = vld [vmem:[%s1403_s0] sm:$0xff] (!%p987_p5)   ;;  %v1166_v20 = vmov (!%p987_p5), 0.0  }
 0x1f3   : > { %v599_v28 = vmul.f32 (!%p987_p5), 0.03125, %v598_v27  ;;  %v600_v30 = vmul.f32 (!%p987_p5), %v597_v26, %v597_v26  ;;  %1046 = vmatprep.mubr.msk.bf16.mxu1 (!%p987_p5), %vm737_vm5, %v1099_v0  ;;  %v988_v2 = vld [vmem:[%s1410_s7] ss:$0 sm:$0xff] (!%p987_p5)  ;;  %594 = vst.msk [vmem:[#allocation6] sm:$0x1] (!%p987_p5), %vm593_vm6, %v1166_v20 }
 0x1f4   : > { %595 = vst.msk [vmem:[#allocation7] sm:$0x1] (!%p987_p5), %vm593_vm6, %v1166_v20 }
 0x1f5   : > { %v601_v33 = vsub.f32 %v599_v28, %v600_v30  ;;  %1033 = vmatpush3.bf16.msra.mxu0 %v647_v22 }
 0x1f6   : > { %1034 = vmatprep.subr.bf16.mxu0 %v648_v29 }
 0x1f7   : > { %v602_v35 = vmax.f32 %v601_v33, 0.0 }
 0x1f9   : > { %v604_v36 = vadd.f32 1e-05, %v602_v35  ;;  %1035 = vmatpush3.bf16.msra.mxu0 %v648_v29 }
 0x1fa   : > { %1036 = vmatprep.subr.bf16.mxu0 %v649_v34  ;;  %v837_v0 = vld [vmem:[#allocation6] sm:$0x1] }
 0x1fb   : > { %1101 = vrsqrt.f32 %v604_v36 }
 0x1fd   : > { %1037 = vmatpush3.bf16.msra.mxu0 %v649_v34 }
 0x205   : > { %v1102_v43 = vpop.eup %1101 }
 0x206   : > { %v606_v44 = vmul.f32 %v1102_v43, %v603_v39 }
 0x208   : > { %v608_v50 = vmul.f32 %v606_v44, %v597_v26  ;;  %v620_v51 = vrot.slane %v606_v44, %v1318_v42 }
 0x20a   : > { %v609_v52 = vsub.f32 %v607_v48, %v608_v50  ;;  %v622_v53 = vmul.f32 %v620_v51, %v612_v45  ;;  %v623_v54 = vmul.f32 %v620_v51, %v613_v46  ;;  %v624_v55 = vmul.f32 %v620_v51, %v614_v47 }
 0x20b   : > { %v625_v56 = vmul.f32 %v620_v51, %v615_v49 }
 0x20c   : > { %v630_v57 = vrot.slane %v609_v52, %v1318_v42 }
 0x20e   : > { %v632_v58 = vadd.f32 %v630_v57, %v622_v53  ;;  %v633_v59 = vadd.f32 %v630_v57, %v623_v54  ;;  %v634_v60 = vadd.f32 %v630_v57, %v624_v55  ;;  %v635_v61 = vadd.f32 %v630_v57, %v625_v56 }
 0x210   : > { %v636_v62 = vpack.c.bf16 %v633_v59, %v632_v58  ;;  %v637_v63 = vpack.c.bf16 %v635_v61, %v634_v60 }
 0x212   : > { %1038 = vmatprep.mubr.msk.bf16.mxu0 %vm657_vm4, %v636_v62 }
 0x213   : > { %1039 = vmatmul.mubr.msk.bf16.vlgmr.msra.gmra.mrb[0].mxu0 %vm657_vm4, %v637_v63 }
 0x2e6   : > { %v1040_v1 = vpop.f32.mrb[0].mxu0 }
 0x2e7   : > { %v698_v3 = vpop.f32.mrb[1].mxu0  ;;  %v707_v5 = vadd.f32 %v1040_v1, %v988_v2 }
 0x2e8   : > { %v1041_v4 = vpop.f32.mrb[2].mxu0  ;;  %v699_v8 = vadd.f32 %v988_v2, %v698_v3  ;;  %v854_v3 = vld [vmem:[#allocation7] sm:$0x1] }
 0x2e9   : > { %v710_v6 = vadd.f32 %v1041_v4, %v988_v2  ;;  %v701_v7 = vpop.f32.mrb[3].mxu0 }
 0x2ea   : > { %v702_v9 = vadd.f32 %v988_v2, %v701_v7  ;;  %v807_v14 = vmax.f32 %v699_v8, 0.0 }
 0x2eb   : > { %v714_v10 = vpack.c.bf16 %v710_v6, %v707_v5 }
 0x2ec   : > { %v713_v11 = vpack.c.bf16 %v702_v9, %v699_v8  ;;  %v808_v15 = vmax.f32 %v702_v9, 0.0 }
 0x2ed   : > { %v806_v12 = vunpack.c.h.bf16 %v714_v10  ;;  %v805_v16 = vunpack.c.l.bf16 %v714_v10 }
 0x2ee   : > { %1042 = vmatprep.subr.bf16.mxu1 %v713_v11  ;;  %v1094_v17 = vpack.i.bf16 %v808_v15, %v807_v14  ;;  %v884_v15 = vld [vmem:[%s1411_s8] sm:$0x1] }
 0x2ef   : > { %1043 = vmatpush3.bf16.msra.mxu1 %v713_v11  ;;  %v810_v13 = vmax.f32 %v806_v12, 0.0  ;;  %v809_v19 = vmax.f32 %v805_v16, 0.0 }
 0x2f0   : > { %1044 = vmatprep.subr.bf16.mxu1 %v714_v10  ;;  %1095 = vrot.lane.b32.xlu0 %v1094_v17, %s1165_s13 }
 0x2f1   : > { %821 = vrot.lane.b32.xlu1 %v810_v13, %s1165_s13 }
 0x2f3   : > { %1045 = vmatpush3.bf16.msra.mxu1 %v714_v10 }
 0x2f4   : > { %819 = vrot.lane.b32.xlu0 %v809_v19, %s1165_s13 }
 0x2f6   : > { %1047 = vmatmul.mubr.msk.bf16.vlgmr.msra.gmra.mrb[0].mxu1 %vm737_vm5, %v1100_v18  ;;  %v888_v18 = vld [vmem:[%s1412_s9] sm:$0x1] }
 0x362   : > { %v1096_v21 = vpop.permute.xlu0 %1095 }
 0x363   : > { %v822_v31 = vpop.permute.xlu1 %821 }
 0x366   : > { %v820_v25 = vpop.permute.xlu0 %819 }
 0x3c9   : > { %v1048_v22 = vpop.f32.mrb[0].mxu1 }
 0x3ca   : > { %v801_v23 = vmax.f32 %v1048_v22, 0.0  ;;  %v778_v24 = vpop.f32.mrb[1].mxu1 }
 0x3cb   : > { %v799_v26 = vmax.f32 %v778_v24, 0.0  ;;  %v1049_v27 = vpop.f32.mrb[2].mxu1 }
 0x3cc   : > { %v829_v28 = vadd.f32 %v820_v25, %v801_v23  ;;  %v802_v29 = vmax.f32 %v1049_v27, 0.0  ;;  %v781_v30 = vpop.f32.mrb[3].mxu1 }
 0x3cd   : > { %v1107_v32 = vadd.low.f32.bf16 %v799_v26, %v1096_v21  ;;  %v800_v33 = vmax.f32 %v781_v30, 0.0 }
 0x3ce   : > { %835 = vst.msk [vmem:[#allocation8 + $0x10] sm:$0xff] %vm657_vm4, %v829_v28  ;;  %v830_v34 = vadd.f32 %v822_v31, %v802_v29  ;;  %v857_v37 = vmul.f32 %v829_v28, %v829_v28  ;;  %v841_v43 = vsel %vm657_vm4, %v829_v28, 0.0 }
 0x3cf   : > { %833 = vst.msk [vmem:[#allocation8] sm:$0xff] %vm657_vm4, %v1107_v32  ;;  %v855_v35 = vmul.f32 %v1107_v32, %v1107_v32  ;;  %v1108_v36 = vadd.high.f32.bf16 %v800_v33, %v1096_v21  ;;  %v838_v38 = vsel %vm657_vm4, %v1107_v32, 0.0 }
 0x3d0   : > { %836 = vst.msk [vmem:[#allocation8 + $0x18] sm:$0xff] %vm657_vm4, %v830_v34  ;;  %v858_v45 = vmul.f32 %v830_v34, %v830_v34  ;;  %v862_v49 = vsel %vm657_vm4, %v857_v37, 0.0  ;;  %v843_v50 = vsel %vm657_vm4, %v830_v34, 0.0 }
 0x3d1   : > { %834 = vst.msk [vmem:[#allocation8 + $0x8] sm:$0xff] %vm657_vm4, %v1108_v36  ;;  %v839_v39 = vsel %vm657_vm4, %v1108_v36, 0.0  ;;  %v856_v40 = vmul.f32 %v1108_v36, %v1108_v36  ;;  %v859_v44 = vsel %vm657_vm4, %v855_v35, 0.0 }
 0x3d2   : > { %v840_v41 = vadd.f32 %v839_v39, %v838_v38  ;;  %v864_v53 = vsel %vm657_vm4, %v858_v45, 0.0 }
 0x3d3   : > { %v860_v46 = vsel %vm657_vm4, %v856_v40, 0.0 }
 0x3d4   : > { %v842_v47 = vadd.f32 %v841_v43, %v840_v41  ;;  %v861_v48 = vadd.f32 %v860_v46, %v859_v44 }
 0x3d5   : > { %v893_v24 = vld [vmem:[#allocation8 + $0x10] sm:$0xff] }
 0x3d6   : > { %v844_v51 = vadd.f32 %v843_v50, %v842_v47  ;;  %v863_v52 = vadd.f32 %v862_v49, %v861_v48  ;;  %v891_v22 = vld [vmem:[#allocation8] sm:$0xff] }
 0x3d7   : > { %v894_v25 = vld [vmem:[#allocation8 + $0x18] sm:$0xff] }
 0x3d8   : > { %v845_v54 = vrot.slane %v844_v51, 4  ;;  %v865_v55 = vadd.f32 %v864_v53, %v863_v52  ;;  %v892_v23 = vld [vmem:[#allocation8 + $0x8] sm:$0xff] }
 0x3da   : > { %v846_v56 = vadd.f32 %v845_v54, %v844_v51  ;;  %v866_v57 = vrot.slane %v865_v55, 4 }
 0x3dc   : > { %v847_v58 = vrot.slane %v846_v56, 2  ;;  %v867_v59 = vadd.f32 %v866_v57, %v865_v55 }
 0x3de   : > { %v848_v60 = vadd.f32 %v847_v58, %v846_v56  ;;  %v868_v61 = vrot.slane %v867_v59, 2 }
 0x3e0   : > { %v849_v62 = vrot.slane %v848_v60, 1  ;;  %v869_v63 = vadd.f32 %v868_v61, %v867_v59 }
 0x3e2   : > { %v850_v1 = vadd.f32 %v849_v62, %v848_v60  ;;  %v870_v2 = vrot.slane %v869_v63, 1 }
 0x3e4   : > { %v851_v4 = vadd.f32 %v850_v1, %v837_v0  ;;  %v871_v5 = vadd.f32 %v870_v2, %v869_v63 }
 0x3e6   : > { %853 = vst.msk [vmem:[#allocation6] sm:$0x1] %vm593_vm6, %v851_v4  ;;  %v872_v6 = vadd.f32 %v871_v5, %v854_v3 }
 0x3e8   : > { %873 = vst.msk [vmem:[#allocation7] sm:$0x1] %vm593_vm6, %v872_v6 }
 0x3ed   : > { %v877_v7 = vld [vmem:[#allocation6] sm:$0x1] }
 0x3ee   : > { %v878_v8 = vmul.f32 0.03125, %v877_v7 }
 0x3ef   : > { %v879_v9 = vld [vmem:[#allocation7] sm:$0x1] }
 0x3f0   : > { %v880_v10 = vmul.f32 0.03125, %v879_v9  ;;  %v881_v11 = vmul.f32 %v878_v8, %v878_v8 }
 0x3f2   : > { %v882_v12 = vsub.f32 %v880_v10, %v881_v11 }
 0x3f4   : > { %v883_v13 = vmax.f32 %v882_v12, 0.0 }
 0x3f6   : > { %v885_v14 = vadd.f32 1e-05, %v883_v13 }
 0x3f8   : > { %1103 = vrsqrt.f32 %v885_v14 }
 0x402   : > { %v1104_v16 = vpop.eup %1103 }
 0x403   : > { %v887_v17 = vmul.f32 %v1104_v16, %v884_v15 }
 0x405   : > { %v889_v19 = vmul.f32 %v887_v17, %v878_v8  ;;  %v899_v20 = vrot.slane %v887_v17, %v1318_v42 }
 0x407   : > { %v890_v21 = vsub.f32 %v888_v18, %v889_v19  ;;  %v901_v26 = vmul.f32 %v899_v20, %v891_v22  ;;  %v902_v27 = vmul.f32 %v899_v20, %v892_v23  ;;  %v903_v28 = vmul.f32 %v899_v20, %v893_v24 }
 0x408   : > { %v904_v29 = vmul.f32 %v899_v20, %v894_v25 }
 0x409   : > { %v909_v30 = vrot.slane %v890_v21, %v1318_v42 }
 0x40b   : > { %v911_v31 = vadd.f32 %v909_v30, %v901_v26  ;;  %v912_v32 = vadd.f32 %v909_v30, %v902_v27  ;;  %v913_v33 = vadd.f32 %v909_v30, %v903_v28  ;;  %v914_v34 = vadd.f32 %v909_v30, %v904_v29 }
 0x40d   : > { %915 = vst.msk [vmem:[#allocation8] sm:$0xff] %vm657_vm4, %v911_v31  ;;  %916 = vst.msk [vmem:[#allocation8 + $0x8] sm:$0xff] %vm657_vm4, %v912_v32 }
 0x40e   : > { %917 = vst.msk [vmem:[#allocation8 + $0x10] sm:$0xff] %vm657_vm4, %v913_v33  ;;  %918 = vst.msk [vmem:[#allocation8 + $0x18] sm:$0xff] %vm657_vm4, %v914_v34 }
 0x40f PF: > { %p1368_p6 = scmp.eq.s32.totalorder %s976_s16, 1  ;;  %s1167_s22 = smov [#allocation8]  }
 0x410   : > { %s925_s23 = sshll.u32 %s1167_s22, 4  ;;  %s926_s23 = int_to_ptr.vmem [resolvable:$true] %s925_s23 }
 0x411   : > { %s1109_s24 = scalar_lea.vmem %s926_s23, 512  ;;  %p1116_p10 = scmp.lt.s32.totalorder %s926_s23, %s926_s23 }
 0x412   : > { %p1110_p7 = scmp.ne.s32.totalorder %s926_s23, %s1109_s24  ;;  %p1117_p11 = scmp.lt.s32.totalorder %s1109_s24, %s1109_s24 }
 0x414   : > { %p1111_p8 = pnand %p1110_p7, %p1368_p6  ;;  %p1118_p12 = por %p1117_p11, %p1116_p10 }
 0x416   : > { %p1112_p9 = pneg %p1111_p8 }
 0x418   : > { %p1119_p13 = pnand %p1118_p12, %p1112_p9 }
 0x41a   : > { %1122 = shalt.err (!%p1119_p13)
}
 0x41b   : > { %s1123_s16 = scalar_lea.hbm %s1413_s10, 512 }
 0x41c   : > { %p1124_p0 = scmp.ne.s32.totalorder %s1413_s10, %s1123_s16  ;;  %p1129_p3 = scmp.lt.u32.totalorder %s1123_s16, %s1413_s10 }
 0x41e   : > { %p1125_p1 = pnand %p1124_p0, %p1368_p6 }
 0x420   : > { %p1126_p2 = pneg %p1125_p1 }
 0x422   : > { %p1131_p4 = pnand %p1129_p3, %p1126_p2 }
 0x424   : > { %1134 = shalt.err (!%p1131_p4)
}
 0x425   : > { %s1168_s30 = smov 128   ;;  %s1169_s11 = smov 8  }
 0x426   : > { %1051 = dma.vmem_to_hbm [thread:$0]  (%p1368_p6), %s926_s23, 512, %s1413_s10, [#allocation9], %s1168_s30, %s1168_s30, %s1169_s11  }
 0x427   : > { %1148 = dma.done.wait (%p1368_p6), [#allocation9], 512  }
 0x428   : > { %1150 = vsyncadd (%p1368_p6), [#allocation9], 4294966784 }
 0x429 PF: > { %s21_s15 = sadd.s32 1, %s1161_s15   ;;  %s1415_s13 = smov %s1157_s14 }
 0x42a   : > { %p18_p5 = scmp.ge.s32.totalorder %s21_s15, 4   ;;  %s1416_s14 = smov %s1418_s17 }
 0x42c   :  { %20 = sbr.rel (!%p18_p5) target bundleno = 2 (0x2), region = 110 }
 0x433   :  { %941 = vsyncpa [#allocation9], 1 }
 0x434   :  { %943 = vsyncpa [#allocation9 + $0x1], 1 }

</bundles_post_ra>
